<compile_context>
chip_gen: v7x
topology: tpu7x:2x2x1
jax: 0.10.0
libtpu: 0.0.40
codegen_flags: <defaults>
</compile_context>

<pallas_src>
import math

import jax
import jax.numpy as jnp
from jax.experimental import pallas as pl
from jax.experimental.pallas import tpu as pltpu


_TM_MAX = 8192                  # absolute cap on folded rows per grid step
_STREAM_VMEM_BUDGET = 24 << 20  # bytes for the double-buffered streamed blocks
_MIN_ROWS_FOR_PALLAS = 4096     # below this a fused XLA op beats launch overhead
_MAX_FOLD_LANES = 2048          # cap on folded output width (lanes)


def _cdiv(a, b):
    return -(-a // b)


def _round_up(x, n):
    return ((x + n - 1) // n) * n


def _embed_kernel(x_ref, w_ref, b_ref, o_ref):
    # x_ref: (TM, fold*K)  w_ref: (fold*K, Hp)  b_ref: (1, Hp)  o_ref: (TM, Hp)
    y = jnp.dot(x_ref[...], w_ref[...], preferred_element_type=jnp.float32)
    o_ref[...] = jnp.maximum(y + b_ref[...], 0.0).astype(o_ref.dtype)


def _pick_fold(in_feat, hidden):
    """Smallest fold with fold*hidden % 128 == 0, then scale by powers of two to
    densify the input rows (fold*in_feat -> up to 128 lanes) while keeping the
    folded output width <= _MAX_FOLD_LANES."""
    fold = 128 // math.gcd(hidden, 128)
    if fold * hidden > _MAX_FOLD_LANES:
        return 1  # pathological hidden: fall back to lane padding
    while (2 * fold * in_feat <= 128) and (2 * fold * hidden <= _MAX_FOLD_LANES):
        fold *= 2
    return fold


def _fold_weights(weight, bias, fold, h_pad):
    """Block-diagonal folded weight (fold*K, h_pad) and tiled bias (1, h_pad)."""
    in_feat, hidden = weight.shape
    k_fold = fold * in_feat
    h_fold = fold * hidden
    eye = jnp.eye(fold, dtype=weight.dtype)
    w_fold = jnp.einsum("rs,kh->rksh", eye, weight).reshape(k_fold, h_fold)
    b_fold = jnp.tile(bias, fold).reshape(1, h_fold)
    if h_pad != h_fold:
        w_fold = jnp.pad(w_fold, ((0, 0), (0, h_pad - h_fold)))
        b_fold = jnp.pad(b_fold, ((0, 0), (0, h_pad - h_fold)))
    return w_fold, b_fold


def make_ethucy_feature_extractor(weight, bias, *,
                                  min_rows_for_pallas=_MIN_ROWS_FOR_PALLAS):
    """Returns apply(inputs) computing relu(inputs @ weight + bias).

    weight: (6, hidden_size) float32 (transposed vs. torch Linear.weight)
    bias:   (hidden_size,)   float32
    Folded weight/bias are precomputed once here and reused per call.
    """
    weight = jnp.asarray(weight, jnp.float32)
    bias = jnp.asarray(bias, jnp.float32)
    in_feat, hidden = weight.shape

    fold = _pick_fold(in_feat, hidden)
    k_fold = fold * in_feat
    h_fold = fold * hidden
    h_pad = _round_up(h_fold, 128)
    w_fold, b_fold = _fold_weights(weight, bias, fold, h_pad)

    def apply(inputs):
        assert inputs.shape[-1] == in_feat
        lead_shape = inputs.shape[:-1]
        m = 1
        for d in lead_shape:
            m *= d

        if m < min_rows_for_pallas:
            # Tiny problem: kernel launch/per-step overhead dominates; let XLA fuse.
            y = jnp.einsum("...k,kh->...h", inputs, weight) + bias
            return jnp.maximum(y, 0.0)

        # ---- fold rows into lanes (pad only up to a multiple of `fold`) -----
        m_fold = _cdiv(m, fold)
        m_pad = m_fold * fold
        x2d = inputs.reshape(m, in_feat)
        if m_pad != m:
            x2d = jnp.pad(x2d, ((0, m_pad - m), (0, 0)))
        xf = x2d.reshape(m_fold, k_fold)

        # ---- row tile: big, within VMEM budget, but keep >=2 grid steps -----
        # Input block is lane-padded in VMEM (k_fold -> 128 lanes), count that.
        bytes_per_row = 4 * (_round_up(k_fold, 128) + h_pad) * 2  # double-buffered
        tm_cap = max(8, min(_TM_MAX,
                            (_STREAM_VMEM_BUDGET // bytes_per_row) // 8 * 8))
        tm = min(tm_cap, _round_up(_cdiv(m_fold, 2), 8))
        grid = (_cdiv(m_fold, tm),)

        vmem_bytes = (tm * bytes_per_row
                      + 2 * 4 * (_round_up(k_fold, 8) * h_pad + 8 * h_pad))
        vmem_limit = min(64 << 20, max(32 << 20, vmem_bytes + (8 << 20)))

        cost = pl.CostEstimate(
            flops=2 * m_fold * k_fold * h_pad,
            transcendentals=0,
            bytes_accessed=4 * (m_fold * (k_fold + h_pad)
                                + k_fold * h_pad + h_pad),
        )

        # NOTE: on v7x one could try pipeline_mode=pl.Buffered(3) on the streamed
        # specs; left at the default double-buffering to stay within VMEM on all
        # generations.
        out_f = pl.pallas_call(
            _embed_kernel,
            out_shape=jax.ShapeDtypeStruct((m_fold, h_pad), jnp.float32),
            grid=grid,
            in_specs=[
                pl.BlockSpec((tm, k_fold), lambda i: (i, 0)),      # streamed rows
                pl.BlockSpec((k_fold, h_pad), lambda i: (0, 0)),   # resident weight
                pl.BlockSpec((1, h_pad), lambda i: (0, 0)),        # resident bias
            ],
            out_specs=pl.BlockSpec((tm, h_pad), lambda i: (i, 0)),
            compiler_params=pltpu.CompilerParams(
                dimension_semantics=("parallel",),
                vmem_limit_bytes=vmem_limit),
            cost_estimate=cost,
        )(xf, w_fold, b_fold)

        # Unfold rows; both slices are no-ops in the common case
        # (h_pad == h_fold, m % fold == 0).
        if h_pad != h_fold:
            out_f = out_f[:, :h_fold]
        out2d = out_f.reshape(m_pad, hidden)
        if m_pad != m:
            out2d = out2d[:m]
        return out2d.reshape(*lead_shape, hidden)

    return apply


def ethucy_feature_extractor(inputs, weight, bias, *,
                             min_rows_for_pallas=_MIN_ROWS_FOR_PALLAS):
    """One-shot convenience wrapper (prefer the factory for repeated calls)."""
    return make_ethucy_feature_extractor(
        weight, bias, min_rows_for_pallas=min_rows_for_pallas)(inputs)


def _reference(inputs, weight, bias):
    y = jnp.einsum("...k,kh->...h", inputs, weight) + bias
    return jnp.maximum(y, 0.0)


if __name__ == "__main__":
    hidden_size = 32   # args.hidden_size
    in_feat = 6

    key = jax.random.PRNGKey(0)
    k_x, k_w, k_b, k_x2, k_x3, k_x4 = jax.random.split(key, 6)

    # Deterministic synthetic parameters (no checkpoint load).
    weight = jax.random.normal(k_w, (in_feat, hidden_size), dtype=jnp.float32) * 0.1
    bias = jax.random.normal(k_b, (hidden_size,), dtype=jnp.float32) * 0.1

    extractor = make_ethucy_feature_extractor(weight, bias)
    extractor_force = make_ethucy_feature_extractor(weight, bias,
                                                    min_rows_for_pallas=0)

    # --- small shape from the module spec: (batch=2, seq=8, 6) ---------------
    x_small = jax.random.normal(k_x, (2, 8, in_feat), dtype=jnp.float32)
    ref_small = _reference(x_small, weight, bias)

    # Default path: tiny M -> fused-XLA fallback.
    out_small = jax.block_until_ready(extractor(x_small))
    assert out_small.shape == (2, 8, hidden_size), out_small.shape
    assert jnp.allclose(out_small, ref_small, atol=1e-5, rtol=1e-5)

    # Forced Pallas path on the same small shape (single ragged block).
    out_small_p = jax.block_until_ready(extractor_force(x_small))
    assert out_small_p.shape == (2, 8, hidden_size), out_small_p.shape
    assert jnp.allclose(out_small_p, ref_small, atol=1e-5, rtol=1e-5)

    # Multi-step grid with a ragged last block
    # (m=16000 -> fold=16 -> m_fold=1000, tm=504, grid=(2,), last block=496).
    x_big = jax.random.normal(k_x2, (16, 1000, in_feat), dtype=jnp.float32)
    out_big = jax.block_until_ready(extractor(x_big))
    ref_big = _reference(x_big, weight, bias)
    assert out_big.shape == (16, 1000, hidden_size), out_big.shape
    assert jnp.allclose(out_big, ref_big, atol=1e-5, rtol=1e-5)

    # Full-size row tiles + ragged last block
    # (m=163840 -> m_fold=10240, tm=4912, grid=(3,), last block=416).
    x_big2 = jax.random.normal(k_x3, (64, 2560, in_feat), dtype=jnp.float32)
    out_big2 = jax.block_until_ready(extractor(x_big2))
    ref_big2 = _reference(x_big2, weight, bias)
    assert out_big2.shape == (64, 2560, hidden_size), out_big2.shape
    assert jnp.allclose(out_big2, ref_big2, atol=1e-5, rtol=1e-5)

    # m not a multiple of fold (exercises the small row pad + trailing slice).
    x_odd = jax.random.normal(k_x4, (3, 7, in_feat), dtype=jnp.float32)
    out_odd = jax.block_until_ready(extractor_force(x_odd))
    ref_odd = _reference(x_odd, weight, bias)
    assert out_odd.shape == (3, 7, hidden_size), out_odd.shape
    assert jnp.allclose(out_odd, ref_odd, atol=1e-5, rtol=1e-5)

    print("KERNEL_OK")
</pallas_src>

<mosaic_0001>
module attributes {stable_mosaic.version = 11 : i64} {
  func.func @_embed_kernel(%arg0: i32, %arg1: memref<8x96xf32, #tpu.memory_space<vmem>>, %arg2: memref<96x512xf32, #tpu.memory_space<vmem>>, %arg3: memref<1x512xf32, #tpu.memory_space<vmem>>, %arg4: memref<8x512xf32, #tpu.memory_space<vmem>>) attributes {dimension_semantics = [#tpu.dimension_semantics<parallel>], iteration_bounds = array<i64: 1>, scalar_prefetch = 0 : i64, scratch_operands = 0 : i64, tpu.core_type = #tpu.core_type<tc>, window_params = [{transform_indices = @transform_0, window_bounds = array<i64: 8, 96>}, {pipeline_mode = #tpu.pipeline_mode<synchronous>, transform_indices = @transform_1, window_bounds = array<i64: 96, 512>}, {pipeline_mode = #tpu.pipeline_mode<synchronous>, transform_indices = @transform_2, window_bounds = array<i64: 1, 512>}, {transform_indices = @transform_3, window_bounds = array<i64: 8, 512>}]} {
    %c0 = arith.constant 0 : index
    %c0_0 = arith.constant 0 : index
    %0 = vector.load %arg1[%c0, %c0_0] : memref<8x96xf32, #tpu.memory_space<vmem>>, vector<8x96xf32>
    %c0_1 = arith.constant 0 : index
    %c0_2 = arith.constant 0 : index
    %1 = vector.load %arg2[%c0_1, %c0_2] : memref<96x512xf32, #tpu.memory_space<vmem>>, vector<96x512xf32>
    %cst = arith.constant dense<0.000000e+00> : vector<8x512xf32>
    %2 = tpu.matmul %0, %1, %cst {dimension_numbers = #tpu.dot_dimension_numbers<[1], [0], [0], [1], [0, 0, 1, 1], [], []>} : vector<8x96xf32>, vector<96x512xf32>, vector<8x512xf32> -> vector<8x512xf32>
    %c0_3 = arith.constant 0 : index
    %c0_4 = arith.constant 0 : index
    %3 = vector.load %arg3[%c0_3, %c0_4] : memref<1x512xf32, #tpu.memory_space<vmem>>, vector<1x512xf32>
    %4 = vector.broadcast %3 : vector<1x512xf32> to vector<8x512xf32>
    %5 = arith.addf %2, %4 : vector<8x512xf32>
    %cst_5 = arith.constant 0.000000e+00 : f32
    %6 = vector.broadcast %cst_5 : f32 to vector<8x512xf32>
    %7 = arith.maximumf %5, %6 : vector<8x512xf32>
    %c0_6 = arith.constant 0 : index
    %c0_7 = arith.constant 0 : index
    %8 = vector.load %arg4[%c0_6, %c0_7] : memref<8x512xf32, #tpu.memory_space<vmem>>, vector<8x512xf32>
    tpu.vector_store %arg4[%c0_6, %c0_7], %7 {strides = array<i32>} : memref<8x512xf32, #tpu.memory_space<vmem>>, vector<8x512xf32>,
    return
  }
  func.func @transform_0(%arg0: i32) -> (i32, i32) {
    %c0_i32 = arith.constant 0 : i32
    %c0_i32_0 = arith.constant 0 : i32
    return %arg0, %c0_i32 : i32, i32
  }
  func.func @transform_1(%arg0: i32) -> (i32, i32) {
    %c0_i32 = arith.constant 0 : i32
    %c0_i32_0 = arith.constant 0 : i32
    %c0_i32_1 = arith.constant 0 : i32
    return %c0_i32, %c0_i32_0 : i32, i32
  }
  func.func @transform_2(%arg0: i32) -> (i32, i32) {
    %c0_i32 = arith.constant 0 : i32
    %c0_i32_0 = arith.constant 0 : i32
    %c0_i32_1 = arith.constant 0 : i32
    return %c0_i32, %c0_i32_0 : i32, i32
  }
  func.func @transform_3(%arg0: i32) -> (i32, i32) {
    %c0_i32 = arith.constant 0 : i32
    %c0_i32_0 = arith.constant 0 : i32
    return %arg0, %c0_i32 : i32, i32
  }
}

</mosaic_0001>

<bundles_post_ra>
// kernel: tpu_custom_call.1
= control target key start
LH: loop header
LB: loop body
LE: loop exit
PB: predicated region body
PF: predicated region fallthrough
CT: control target
= control target key end

     0   :  { %8 = vsyncpa [#allocation3], 0  ;;  %s597_s0 = inlined_call_operand.hbm [shape: f32[1,96], index: 0, kind: input, shape index: {}]   ;;  %s598_s1 = inlined_call_operand.hbm [shape: f32[96,512], index: 1, kind: input, shape index: {}]   ;;  %s599_s2 = inlined_call_operand.vmem [shape: f32[1,512], index: 2, kind: input, shape index: {}]   ;;  %s600_s3 = inlined_call_operand.hbm [shape: f32[1,512], index: 3, kind: output, shape index: {}]  }
   0x1   :  { %9 = vsyncpa [#allocation6], 0 }
   0x2   :  { %10 = vsyncpa [#allocation4], 0 }
   0x3   :  { %15 = vsyncadd [#allocation3], 112  ;;  %s507_s12 = smov [#allocation2]   ;;  %s435_s16 = scalar_lea.hbm %s597_s0, 16 }
   0x4   :  { %s16_s13 = sshll.u32 %s507_s12, 4  ;;  %p436_p0 = scmp.ne.s32.totalorder %s597_s0, %s435_s16  ;;  %s17_s13 = int_to_ptr.vmem [resolvable:$true] %s16_s13 }
   0x5   :  { %p439_p1 = scmp.lt.u32.totalorder %s435_s16, %s597_s0 }
   0x7   :  { %p441_p2 = pnand %p439_p1, %p436_p0 }
   0x9   :  { %444 = shalt.err (!%p441_p2)
}
   0xa   :  { %s445_s21 = scalar_lea.vmem %s17_s13, 16  ;;  %s449_s22 = scalar_lea.vmem %s17_s13, 128 }
   0xb   :  { %p446_p3 = scmp.ne.s32.totalorder %s17_s13, %s445_s21  ;;  %p450_p4 = scmp.lt.s32.totalorder %s17_s13, %s17_s13 }
   0xc   :  { %p451_p5 = scmp.lt.s32.totalorder %s449_s22, %s445_s21 }
   0xe   :  { %p452_p6 = por %p451_p5, %p450_p4 }
  0x10   :  { %p453_p7 = pnand %p452_p6, %p446_p3 }
  0x12   :  { %456 = shalt.err (!%p453_p7)
}
  0x13   :  { %s508_s23 = smov 16   ;;  %s509_s24 = smov 1  }
  0x14   :  { %22 = dma.hbm_to_vmem [thread:$0]  %s597_s0, 16, %s17_s13, [#allocation3], %s508_s23, %s508_s23, %s509_s24  }
  0x15   :  { %s510_s27 = smov [#allocation5]   ;;  %s457_s4 = scalar_lea.hbm %s598_s1, 6144 }
  0x16   :  { %s28_s28 = sshll.u32 %s510_s27, 4  ;;  %p458_p8 = scmp.ne.s32.totalorder %s598_s1, %s457_s4  ;;  %s29_s28 = int_to_ptr.vmem [resolvable:$true] %s28_s28 }
  0x17   :  { %p461_p9 = scmp.lt.u32.totalorder %s457_s4, %s598_s1 }
  0x19   :  { %p463_p10 = pnand %p461_p9, %p458_p8 }
  0x1b   :  { %466 = shalt.err (!%p463_p10)
}
  0x1c   :  { %s467_s9 = scalar_lea.vmem %s29_s28, 6144  ;;  %p472_p12 = scmp.lt.s32.totalorder %s29_s28, %s29_s28 }
  0x1d   :  { %p468_p11 = scmp.ne.s32.totalorder %s29_s28, %s467_s9  ;;  %p473_p13 = scmp.lt.s32.totalorder %s467_s9, %s467_s9 }
  0x1f   :  { %p474_p0 = por %p473_p13, %p472_p12 }
  0x21   :  { %p475_p1 = pnand %p474_p0, %p468_p11 }
  0x23   :  { %478 = shalt.err (!%p475_p1)
}
  0x24   :  { %s511_s0 = smov 512   ;;  %s512_s10 = smov 32  }
  0x25   :  { %34 = dma.hbm_to_vmem [thread:$0]  %s598_s1, 6144, %s29_s28, [#allocation6], %s511_s0, %s511_s0, %s512_s10  }
  0x26   :  { %501 = dma.done.wait [#allocation3], 128  }
  0x27   :  { %502 = vsyncadd [#allocation3], 4294967168 }
  0x28   :  { %503 = dma.done.wait [#allocation6], 6144  }
  0x29   :  { %504 = vsyncadd [#allocation6], 4294961152  ;;  %v513_v0 = vmov 0.0   ;;  %v45_v1 = vld [vmem:[#allocation5 + $0x8] sm:$0xff]  ;;  %v47_v3 = vld [vmem:[#allocation5 + $0x18] sm:$0xff]  ;;  %vm114_vm0 = vcmask 785408  }
  0x2a   :  { %182 = vmatprep.mubr.f32.mxu0 %v513_v0  ;;  %253 = vmatprep.mubr.f32.mxu1 %v513_v0  ;;  %v49_v2 = vld [vmem:[#allocation5 + $0x28] sm:$0xff]  ;;  %v51_v5 = vld [vmem:[#allocation5 + $0x38] sm:$0xff]  ;;  %v44_v6 = vld [vmem:[#allocation5] sm:$0xff] }
  0x2b   :  { %v376_v4 = vpack.c.bf16 %v49_v2, %v45_v1  ;;  %v48_v7 = vld [vmem:[#allocation5 + $0x20] sm:$0xff]  ;;  %v400_v8 = vpack.c.bf16 %v51_v5, %v47_v3  ;;  %v46_v10 = vld [vmem:[#allocation5 + $0x10] sm:$0xff]  ;;  %v53_v12 = vld [vmem:[#allocation5 + $0x48] sm:$0xff] }
  0x2c   :  { %v378_v9 = vpack.c.bf16 %v48_v7, %v44_v6  ;;  %v50_v11 = vld [vmem:[#allocation5 + $0x30] sm:$0xff]  ;;  %v57_v14 = vld [vmem:[#allocation5 + $0x68] sm:$0xff]  ;;  %v55_v15 = vld [vmem:[#allocation5 + $0x58] sm:$0xff] }
  0x2d   :  { %377 = vmatprep.subr.bf16.mxu0 %v376_v4  ;;  %v402_v13 = vpack.c.bf16 %v50_v11, %v46_v10  ;;  %v59_v16 = vld [vmem:[#allocation5 + $0x78] sm:$0xff]  ;;  %401 = vmatprep.subr.bf16.mxu1 %v400_v8  ;;  %v380_v17 = vpack.c.bf16 %v57_v14, %v53_v12  ;;  %v52_v19 = vld [vmem:[#allocation5 + $0x40] sm:$0xff]  ;;  %v54_v21 = vld [vmem:[#allocation5 + $0x50] sm:$0xff]  ;;  %v94_v10 = vlaneseq }
  0x2e   :  { %379 = vmatpush1.bf16.msra.mxu0 %v378_v9  ;;  %v404_v18 = vpack.c.bf16 %v59_v16, %v55_v15  ;;  %v56_v20 = vld [vmem:[#allocation5 + $0x60] sm:$0xff]  ;;  %v58_v23 = vld [vmem:[#allocation5 + $0x70] sm:$0xff]  ;;  %v61_v24 = vld [vmem:[#allocation5 + $0x88] sm:$0xff] }
  0x2f   :  { %403 = vmatpush1.bf16.msra.mxu1 %v402_v13  ;;  %v382_v22 = vpack.c.bf16 %v56_v20, %v52_v19  ;;  %v65_v25 = vld [vmem:[#allocation5 + $0xa8] sm:$0xff]  ;;  %381 = vmatprep.subr.bf16.mxu0 %v380_v17  ;;  %v406_v26 = vpack.c.bf16 %v58_v23, %v54_v21  ;;  %v63_v28 = vld [vmem:[#allocation5 + $0x98] sm:$0xff]  ;;  %v60_v30 = vld [vmem:[#allocation5 + $0x80] sm:$0xff]  ;;  %v95_v11 = vshrl.u32 %v94_v10, 7  ;;  %v514_v17 = vmov 1966171168  }
  0x30   :  { %405 = vmatprep.subr.bf16.mxu1 %v404_v18  ;;  %v384_v27 = vpack.c.bf16 %v65_v25, %v61_v24  ;;  %v67_v29 = vld [vmem:[#allocation5 + $0xb8] sm:$0xff]  ;;  %v64_v32 = vld [vmem:[#allocation5 + $0xa0] sm:$0xff]  ;;  %v62_v33 = vld [vmem:[#allocation5 + $0x90] sm:$0xff]  ;;  %v273_v18 = vunpack.c.l.s4 %v514_v17  ;;  %vm565_vm1 = vcmp.lt.s32.totalorder %v94_v10, 512 }
  0x31   :  { %v408_v31 = vpack.c.bf16 %v67_v29, %v63_v28  ;;  %v66_v34 = vld [vmem:[#allocation5 + $0xb0] sm:$0xff]  ;;  %v386_v35 = vpack.c.bf16 %v64_v32, %v60_v30  ;;  %v69_v36 = vld [vmem:[#allocation5 + $0xc8] sm:$0xff]  ;;  %v71_v38 = vld [vmem:[#allocation5 + $0xd8] sm:$0xff]  ;;  %v96_v12 = vsub.s32 0, %v95_v11  ;;  %v104_v14 = vsub.s32 2, %v95_v11 }
  0x32   :  { %383 = vmatpush1.bf16.msra.mxu0 %v382_v22  ;;  %v73_v37 = vld [vmem:[#allocation5 + $0xe8] sm:$0xff]  ;;  %v410_v39 = vpack.c.bf16 %v66_v34, %v62_v33  ;;  %v75_v41 = vld [vmem:[#allocation5 + $0xf8] sm:$0xff]  ;;  %v68_v42 = vld [vmem:[#allocation5 + $0xc0] sm:$0xff]  ;;  %v100_v15 = vsub.s32 1, %v95_v11  ;;  %v108_v16 = vsub.s32 3, %v95_v11  ;;  %v274_v24 = vunpack.c.0.s8 %v273_v18 }
  0x33   :  { %407 = vmatpush1.bf16.msra.mxu1 %v406_v26  ;;  %385 = vmatprep.subr.bf16.mxu0 %v384_v27  ;;  %v388_v40 = vpack.c.bf16 %v73_v37, %v69_v36  ;;  %v72_v43 = vld [vmem:[#allocation5 + $0xe0] sm:$0xff]  ;;  %v412_v44 = vpack.c.bf16 %v75_v41, %v71_v38  ;;  %v70_v45 = vld [vmem:[#allocation5 + $0xd0] sm:$0xff]  ;;  %v77_v47 = vld [vmem:[#allocation5 + $0x108] sm:$0xff] }
  0x34   :  { %409 = vmatprep.subr.bf16.mxu1 %v408_v31  ;;  %v74_v46 = vld [vmem:[#allocation5 + $0xf0] sm:$0xff]  ;;  %v81_v48 = vld [vmem:[#allocation5 + $0x128] sm:$0xff]  ;;  %v79_v49 = vld [vmem:[#allocation5 + $0x118] sm:$0xff]  ;;  %v390_v51 = vpack.c.bf16 %v72_v43, %v68_v42  ;;  %v277_v33 = vsub.s32 %v274_v24, %v95_v11 }
  0x35   :  { %v83_v50 = vld [vmem:[#allocation5 + $0x138] sm:$0xff]  ;;  %v414_v52 = vpack.c.bf16 %v74_v46, %v70_v45  ;;  %v392_v53 = vpack.c.bf16 %v81_v48, %v77_v47  ;;  %v76_v54 = vld [vmem:[#allocation5 + $0x100] sm:$0xff]  ;;  %v78_v56 = vld [vmem:[#allocation5 + $0x110] sm:$0xff] }
  0x36   :  { %387 = vmatpush1.bf16.msra.mxu0 %v386_v35  ;;  %v80_v55 = vld [vmem:[#allocation5 + $0x120] sm:$0xff]  ;;  %v416_v57 = vpack.c.bf16 %v83_v50, %v79_v49  ;;  %v82_v58 = vld [vmem:[#allocation5 + $0x130] sm:$0xff]  ;;  %v85_v59 = vld [vmem:[#allocation5 + $0x148] sm:$0xff] }
  0x37   :  { %411 = vmatpush1.bf16.msra.mxu1 %v410_v39  ;;  %389 = vmatprep.subr.bf16.mxu0 %v388_v40  ;;  %v89_v60 = vld [vmem:[#allocation5 + $0x168] sm:$0xff]  ;;  %v87_v61 = vld [vmem:[#allocation5 + $0x158] sm:$0xff]  ;;  %v394_v63 = vpack.c.bf16 %v80_v55, %v76_v54  ;;  %v418_v0 = vpack.c.bf16 %v82_v58, %v78_v56  ;;  %v84_v2 = vld [vmem:[#allocation5 + $0x140] sm:$0xff] }
  0x38   :  { %413 = vmatprep.subr.bf16.mxu1 %v412_v44  ;;  %v91_v62 = vld [vmem:[#allocation5 + $0x178] sm:$0xff]  ;;  %v396_v1 = vpack.c.bf16 %v89_v60, %v85_v59  ;;  %v88_v3 = vld [vmem:[#allocation5 + $0x160] sm:$0xff]  ;;  %v86_v5 = vld [vmem:[#allocation5 + $0x150] sm:$0xff] }
  0x39   :  { %v420_v4 = vpack.c.bf16 %v91_v62, %v87_v61  ;;  %v90_v6 = vld [vmem:[#allocation5 + $0x170] sm:$0xff]  ;;  %v398_v7 = vpack.c.bf16 %v88_v3, %v84_v2  ;;  %v43_v9 = vld [vmem:[#allocation2] sm:$0xff] }
  0x3a   :  { %391 = vmatpush1.bf16.msra.mxu0 %v390_v51  ;;  %v422_v8 = vpack.c.bf16 %v90_v6, %v86_v5  ;;  %v92_v13 = vld [vmem:[%s599_s2] sm:$0xf] }
  0x3b   :  { %415 = vmatpush1.bf16.msra.mxu1 %v414_v52  ;;  %393 = vmatprep.subr.bf16.mxu0 %v392_v53  ;;  %v97_v19 = vrot.slane %v92_v13, %v96_v12  ;;  %v105_v20 = vrot.slane %v92_v13, %v104_v14  ;;  %v101_v21 = vrot.slane %v92_v13, %v100_v15 }
  0x3c   :  { %417 = vmatprep.subr.bf16.mxu1 %v416_v57  ;;  %v109_v22 = vrot.slane %v92_v13, %v108_v16 }
  0x3e   :  { %395 = vmatpush1.bf16.msra.mxu0 %v394_v63 }
  0x3f   :  { %419 = vmatpush1.bf16.msra.mxu1 %v418_v0  ;;  %397 = vmatprep.subr.bf16.mxu0 %v396_v1 }
  0x40   :  { %421 = vmatprep.subr.bf16.mxu1 %v420_v4 }
  0x42   :  { %399 = vmatpush1.bf16.msra.mxu0 %v398_v7 }
  0x43   :  { %423 = vmatpush1.bf16.msra.mxu1 %v422_v8 }
  0x45   :  { %374 = vmatmul.mubr.msk.f32.vlgmr.msra.gmra.mrb[0].mxu0 %vm114_vm0, %v43_v9 }
  0x46   :  { %375 = vmatmul.mubr.msk.f32.vlgmr.msra.gmra.mrb[0].mxu1 %vm114_vm0, %v43_v9 }
 0x118   :  { %v184_v23 = vpop.f32.mrb[0].mxu0 }
 0x119   :  { %v185_v25 = vadd.f32 %v184_v23, %v97_v19  ;;  %v255_v26 = vpop.f32.mrb[0].mxu1  ;;  %v186_v27 = vpop.f32.mrb[1].mxu0 }
 0x11a   :  { %v256_v28 = vadd.f32 %v255_v26, %v105_v20  ;;  %v187_v29 = vadd.f32 %v186_v27, %v101_v21  ;;  %v257_v30 = vpop.f32.mrb[1].mxu1 }
 0x11b   :  { %v260_v31 = vmax.f32 %v185_v25, 0.0  ;;  %v258_v32 = vadd.f32 %v257_v30, %v109_v22 }
 0x11c   :  { %v262_v34 = vmax.f32 %v256_v28, 0.0  ;;  %v261_v35 = vmax.f32 %v187_v29, 0.0 }
 0x11d   :  { %v263_v36 = vmax.f32 %v258_v32, 0.0 }
 0x11e   :  { %v268_v37 = vcombine.low %v260_v31, %v261_v35  ;;  %v269_v38 = vcombine.high %v260_v31, %v261_v35 }
 0x11f   :  { %v270_v39 = vcombine.low %v262_v34, %v263_v36  ;;  %v271_v40 = vcombine.high %v262_v34, %v263_v36 }
 0x120   :  { %v278_v41 = vrot.slane %v268_v37, %v277_v33  ;;  %v285_v42 = vrot.slane %v269_v38, %v277_v33 }
 0x121   :  { %v292_v43 = vrot.slane %v270_v39, %v277_v33  ;;  %v299_v44 = vrot.slane %v271_v40, %v277_v33 }
 0x123   :  { %v300_v45 = vcombine.low %v278_v41, %v292_v43  ;;  %v301_v46 = vcombine.high %v278_v41, %v292_v43  ;;  %v302_v47 = vcombine.low %v285_v42, %v299_v44  ;;  %v303_v48 = vcombine.high %v285_v42, %v299_v44 }
 0x125   :  { %v310_v50 = vrot.slane %v300_v45, %v277_v33  ;;  %v317_v51 = vrot.slane %v302_v47, %v277_v33  ;;  %v324_v52 = vrot.slane %v301_v46, %v277_v33  ;;  %v331_v53 = vrot.slane %v303_v48, %v277_v33 }
 0x127   :  { %v332_v54 = vcombine.high %v310_v50, %v310_v50  ;;  %v333_v55 = vcombine.high %v317_v51, %v317_v51  ;;  %v334_v56 = vcombine.high %v324_v52, %v324_v52  ;;  %v335_v57 = vcombine.high %v331_v53, %v331_v53  ;;  %348 = vst.msk [vmem:[#allocation7] sm:$0xf] %vm565_vm1, %v310_v50 }
 0x128   :  { %349 = vst.msk [vmem:[#allocation7 + $0x4] sm:$0xf] %vm565_vm1, %v324_v52  ;;  %352 = vst.msk [vmem:[#allocation7 + $0x10] sm:$0xf] %vm565_vm1, %v317_v51 }
 0x129   :  { %353 = vst.msk [vmem:[#allocation7 + $0x14] sm:$0xf] %vm565_vm1, %v331_v53  ;;  %350 = vst.msk [vmem:[#allocation7 + $0x8] sm:$0xf] %vm565_vm1, %v332_v54 }
 0x12a   :  { %351 = vst.msk [vmem:[#allocation7 + $0xc] sm:$0xf] %vm565_vm1, %v334_v56  ;;  %354 = vst.msk [vmem:[#allocation7 + $0x18] sm:$0xf] %vm565_vm1, %v333_v55 }
 0x12b   :  { %355 = vst.msk [vmem:[#allocation7 + $0x1c] sm:$0xf] %vm565_vm1, %v335_v57 }
 0x12c   :  { %360 = vsyncadd [#allocation4], 448  ;;  %s515_s2 = smov [#allocation7]  }
 0x12d   :  { %s361_s14 = sshll.u32 %s515_s2, 4  ;;  %s362_s14 = int_to_ptr.vmem [resolvable:$true] %s361_s14 }
 0x12e   :  { %s479_s15 = scalar_lea.vmem %s362_s14, 64  ;;  %s483_s16 = scalar_lea.vmem %s362_s14, 512 }
 0x12f   :  { %p480_p2 = scmp.ne.s32.totalorder %s362_s14, %s479_s15  ;;  %p484_p3 = scmp.lt.s32.totalorder %s362_s14, %s362_s14 }
 0x130   :  { %p485_p4 = scmp.lt.s32.totalorder %s483_s16, %s479_s15 }
 0x132   :  { %p486_p5 = por %p485_p4, %p484_p3 }
 0x134   :  { %p487_p6 = pnand %p486_p5, %p480_p2 }
 0x136   :  { %490 = shalt.err (!%p487_p6)
}
 0x137   :  { %s491_s19 = scalar_lea.hbm %s600_s3, 64 }
 0x138   :  { %p492_p7 = scmp.ne.s32.totalorder %s600_s3, %s491_s19  ;;  %p495_p8 = scmp.lt.u32.totalorder %s491_s19, %s600_s3 }
 0x13a   :  { %p497_p9 = pnand %p495_p8, %p492_p7 }
 0x13c   :  { %500 = shalt.err (!%p497_p9)
}
 0x13d   :  { %s516_s24 = smov 64   ;;  %s517_s25 = smov 4  }
 0x13e   :  { %367 = dma.vmem_to_hbm [thread:$0]  %s362_s14, 64, %s600_s3, [#allocation4], %s516_s24, %s516_s24, %s517_s25  }
 0x13f   :  { %505 = dma.done.wait [#allocation4], 512  }
 0x140   :  { %506 = vsyncadd [#allocation4], 4294966784 }
 0x141   :  { %371 = vsyncpa [#allocation3], 1 }
 0x142   :  { %372 = vsyncpa [#allocation6], 1 }
 0x143   :  { %373 = vsyncpa [#allocation4], 1 }

</bundles_post_ra>
